<compile_context>
chip_gen: v7x
topology: tpu7x:2x2x1
jax: 0.10.0
libtpu: 0.0.40
codegen_flags: <defaults>
</compile_context>

<pallas_src>
import math
import functools

import jax
import jax.numpy as jnp
from jax.experimental import pallas as pl
from jax.experimental.pallas import tpu as pltpu


def _ipow(base, p):
    """Integer power by repeated multiply (p is a static Python int >= 0)."""
    if p == 0:
        return jnp.ones_like(base)
    r = base
    for _ in range(p - 1):
        r = r * base
    return r


def _lsoftmax_kernel(end_class_ref, beta_ref, x_ref, wT_ref, wn2_ref, tgt_ref, out_ref,
                     *, margin, k_thresholds):
    # logits matmul: bf16 in, f32 accumulate (native MXU rate, half the HBM/VMEM
    # traffic for x and W compared to f32).
    logit = jnp.dot(x_ref[...], wT_ref[...],
                    preferred_element_type=jnp.float32)               # [tB, C] f32
    tb, c = logit.shape

    # One column iota, reused for the target mask and the end_class mask.
    col = jax.lax.broadcasted_iota(jnp.int32, (tb, c), 1)
    tgt = tgt_ref[...]                                                 # [tB, 1] i32
    tgt_mask = col == tgt                                              # [tB, C] bool

    # logit[i, target[i]] via masked lane reduction (no gather).
    logit_target = jnp.sum(jnp.where(tgt_mask, logit, 0.0), axis=1, keepdims=True)

    # ||W[target[i]]|| from precomputed per-class squared norms (no second matmul).
    wn2 = wn2_ref[...]                                                 # [1, C] f32
    w_target_norm = jnp.sqrt(
        jnp.sum(jnp.where(tgt_mask, wn2, 0.0), axis=1, keepdims=True))
    x32 = x_ref[...].astype(jnp.float32)                               # [tB, D]
    x_norm = jnp.sqrt(jnp.sum(x32 * x32, axis=1, keepdims=True))

    cos_theta = logit_target / (w_target_norm * x_norm + 1e-10)        # [tB, 1]

    # cos(m * theta) multiple-angle expansion (margin is static -> fully unrolled).
    sin2 = 1.0 - cos_theta * cos_theta
    cos_m_theta = jnp.zeros_like(cos_theta)
    for n in range(margin // 2 + 1):
        sign = 1.0 if n % 2 == 0 else -1.0
        coeff = float(math.comb(margin, 2 * n))
        cos_m_theta = cos_m_theta + sign * coeff * \
            _ipow(cos_theta, margin - 2 * n) * _ipow(sin2, n)

    # k = floor(acos(clamp(cos)) / (pi / m)) without acos (Mosaic-safe):
    #   k = #{ j in 1..m-1 : cos <= cos(j*pi/m) }   (thresholds are static)
    eps = 1e-7
    cos_c = jnp.clip(cos_theta, -1.0 + eps, 1.0 - eps)
    k = jnp.zeros_like(cos_theta)
    for thr in k_thresholds:
        k = k + jnp.where(cos_c <= thr, 1.0, 0.0)
    minus_one_pow_k = jnp.where(jnp.mod(k, 2.0) < 0.5, 1.0, -1.0)       # (-1)**k

    upd = w_target_norm * x_norm * (minus_one_pow_k * cos_m_theta - 2.0 * k)
    beta = beta_ref[0]
    upd_beta = (upd + beta * logit_target) / (1.0 + beta)               # [tB, 1]

    # Scatter the updated value into the target column.
    new_logit = jnp.where(tgt_mask, upd_beta, logit)                    # [tB, C]

    # CrossEntropy (per-row) over new_logit[:, :end_class]; the mean over the
    # *full* batch is done by the wrapper (sum(per_row[:B]) / B).
    end_class = end_class_ref[0]
    valid = col < end_class
    masked = jnp.where(valid, new_logit, jnp.float32(-1e30))
    row_max = jnp.max(masked, axis=1, keepdims=True)
    exps = jnp.exp(masked - row_max)              # invalid columns underflow to 0
    lse = row_max + jnp.log(jnp.sum(exps, axis=1, keepdims=True))       # [tB, 1]
    out_ref[...] = lse - upd_beta                                       # [tB, 1]


def lsoftmax_loss(x, weight, target, end_class, *, margin, beta=0.0, tile_b=None):
    """Training-mode forward of LSoftmaxLoss. Returns scalar mean CE loss.

    x: [B, D] float, weight: [C, D] (like nn.Linear.weight), target: [B] int.
    """
    x = jnp.asarray(x)
    weight = jnp.asarray(weight)
    target = jnp.asarray(target, jnp.int32)
    B, D = x.shape
    C = weight.shape[0]

    # Batch tile: multiple of 8 sublanes. ~256 rows is a comfortable default on all
    # generations for moderate C*D; per-step VMEM ~= 2*tile_b*D*2 + C*D*2 + C*4
    # bytes plus a few tile_b*C f32 temporaries. Shrink tile_b (and/or tile C, see
    # TODO above) for v7x's 64 MiB VMEM or v5e's 16 MiB scoped default when C*D
    # gets large.
    if tile_b is None:
        tile_b = min(256, -(-B // 8) * 8)
    assert tile_b % 8 == 0, "tile_b must be a multiple of 8 sublanes"
    nb = -(-B // tile_b)
    b_pad = nb * tile_b

    # bf16 MXU feed; W pre-transposed to [D, C] so the kernel does a plain
    # [tB, D] @ [D, C] contraction and the [tB, C] output is lane-dense over C.
    x_q = x.astype(jnp.bfloat16)
    wT_q = weight.astype(jnp.bfloat16).T                               # [D, C]
    # Per-class squared norms in f32 (of the same bf16-quantized weight the MXU
    # sees) -- replaces the onehot @ W matmul.
    wn2 = jnp.sum(wT_q.astype(jnp.float32) ** 2, axis=0, keepdims=True)  # [1, C]

    if b_pad != B:
        x_q = jnp.pad(x_q, ((0, b_pad - B), (0, 0)))
        target = jnp.pad(target, (0, b_pad - B))
    tgt_col = target.reshape(b_pad, 1)                                  # [B_pad, 1]

    kernel = functools.partial(
        _lsoftmax_kernel, margin=margin,
        k_thresholds=tuple(float(math.cos(j * math.pi / margin))
                           for j in range(1, margin)))

    per_row = pl.pallas_call(
        kernel,
        out_shape=jax.ShapeDtypeStruct((b_pad, 1), jnp.float32),
        grid=(nb,),
        in_specs=[
            pl.BlockSpec(memory_space=pltpu.MemorySpace.SMEM),    # end_class (1,)
            pl.BlockSpec(memory_space=pltpu.MemorySpace.SMEM),    # beta (1,)
            pl.BlockSpec((tile_b, D), lambda i: (i, 0)),          # x tile (bf16)
            pl.BlockSpec((D, C), lambda i: (0, 0)),               # W^T (resident)
            pl.BlockSpec((1, C), lambda i: (0, 0)),               # per-class ||w||^2
            pl.BlockSpec((tile_b, 1), lambda i: (i, 0)),          # target column
        ],
        out_specs=pl.BlockSpec((tile_b, 1), lambda i: (i, 0)),
        compiler_params=pltpu.CompilerParams(
            dimension_semantics=("parallel",)),                   # megacore-shardable
    )(
        jnp.array([end_class], jnp.int32),
        jnp.array([beta], jnp.float32),
        x_q, wT_q, wn2, tgt_col,
    )
    # Padded rows (if any) are simply dropped; divide by the TRUE batch size.
    return jnp.sum(per_row[:B, 0]) / B


def _reference(x, weight, target, end_class, margin, beta=0.0):
    """Pure-JAX mirror of the PyTorch forward (training branch).

    x / weight are quantized to bf16 first, matching the kernel's MXU input
    precision (review item: feed the MXU bf16, keep the rest in f32)."""
    xq = x.astype(jnp.bfloat16).astype(jnp.float32)
    wq = weight.astype(jnp.bfloat16).astype(jnp.float32)
    w = wq.T                                        # [D, C]
    logit = jnp.dot(xq, w, precision=jax.lax.Precision.HIGHEST)   # [B, C]
    idx = jnp.arange(x.shape[0])
    logit_target = logit[idx, target]
    w_target_norm = jnp.linalg.norm(w[:, target], axis=0)
    x_norm = jnp.linalg.norm(xq, axis=1)
    cos_t = logit_target / (w_target_norm * x_norm + 1e-10)

    sin2 = 1.0 - cos_t ** 2
    c_m_2n = jnp.array([math.comb(margin, r) for r in range(0, margin + 1, 2)], jnp.float32)
    cos_pows = jnp.array(list(range(margin, -1, -2)), jnp.float32)
    sin2_pows = jnp.arange(cos_pows.shape[0], dtype=jnp.float32)
    signs = jnp.array([1.0 if i % 2 == 0 else -1.0 for i in range(margin // 2 + 1)], jnp.float32)
    cos_m_t = jnp.sum(
        signs[None, :] * c_m_2n[None, :]
        * (cos_t[:, None] ** cos_pows[None, :])
        * (sin2[:, None] ** sin2_pows[None, :]),
        axis=1,
    )
    eps = 1e-7
    k = jnp.floor(jnp.arccos(jnp.clip(cos_t, -1 + eps, 1 - eps)) / (math.pi / margin))
    upd = w_target_norm * x_norm * (((-1.0) ** k) * cos_m_t - 2.0 * k)
    upd_beta = (upd + beta * logit_target) / (1.0 + beta)
    logit = logit.at[idx, target].set(upd_beta)
    sliced = logit[:, :end_class]
    lse = jax.scipy.special.logsumexp(sliced, axis=1)
    return jnp.mean(lse - sliced[idx, target])


if __name__ == "__main__":
    B, D, C = 16, 128, 128
    margin = 4
    end_class = 100

    key = jax.random.PRNGKey(0)
    kx, kw, kt = jax.random.split(key, 3)
    x = jax.random.normal(kx, (B, D), jnp.float32)
    weight = jax.random.normal(kw, (C, D), jnp.float32) * 0.1   # synthetic fc.weight
    target = jax.random.randint(kt, (B,), 0, end_class, jnp.int32)

    # tile_b=8 -> grid of 2 batch tiles, exercising the pipelined/tiled path.
    loss = lsoftmax_loss(x, weight, target, end_class, margin=margin, beta=0.0, tile_b=8)
    loss = jax.block_until_ready(loss)

    ref = jax.block_until_ready(_reference(x, weight, target, end_class, margin, beta=0.0))
    assert jnp.isfinite(loss), "kernel produced non-finite loss"
    assert jnp.allclose(loss, ref, rtol=2e-3, atol=2e-3), (loss, ref)

    print("KERNEL_OK")
</pallas_src>

<mosaic_0001>
module attributes {stable_mosaic.version = 11 : i64} {
  func.func @_lsoftmax_kernel(%arg0: i32, %arg1: memref<1xi32, #tpu.memory_space<smem>>, %arg2: memref<1xf32, #tpu.memory_space<smem>>, %arg3: memref<8x128xbf16, #tpu.memory_space<vmem>>, %arg4: memref<128x128xbf16, #tpu.memory_space<vmem>>, %arg5: memref<1x128xf32, #tpu.memory_space<vmem>>, %arg6: memref<8x1xi32, #tpu.memory_space<vmem>>, %arg7: memref<8x1xf32, #tpu.memory_space<vmem>>) attributes {dimension_semantics = [#tpu.dimension_semantics<parallel>], iteration_bounds = array<i64: 2>, scalar_prefetch = 0 : i64, scratch_operands = 0 : i64, tpu.core_type = #tpu.core_type<tc>, window_params = [{transform_indices = @transform_0, window_bounds = array<i64: 1>}, {transform_indices = @transform_1, window_bounds = array<i64: 1>}, {transform_indices = @transform_2, window_bounds = array<i64: 8, 128>}, {pipeline_mode = #tpu.pipeline_mode<synchronous>, transform_indices = @transform_3, window_bounds = array<i64: 128, 128>}, {pipeline_mode = #tpu.pipeline_mode<synchronous>, transform_indices = @transform_4, window_bounds = array<i64: 1, 128>}, {transform_indices = @transform_5, window_bounds = array<i64: 8, 1>}, {transform_indices = @transform_6, window_bounds = array<i64: 8, 1>}]} {
    %c0 = arith.constant 0 : index
    %c0_0 = arith.constant 0 : index
    %0 = vector.load %arg3[%c0, %c0_0] : memref<8x128xbf16, #tpu.memory_space<vmem>>, vector<8x128xbf16>
    %c0_1 = arith.constant 0 : index
    %c0_2 = arith.constant 0 : index
    %1 = vector.load %arg4[%c0_1, %c0_2] : memref<128x128xbf16, #tpu.memory_space<vmem>>, vector<128x128xbf16>
    %cst = arith.constant dense<0.000000e+00> : vector<8x128xf32>
    %2 = tpu.matmul %0, %1, %cst {dimension_numbers = #tpu.dot_dimension_numbers<[1], [0], [0], [1], [0, 0, 1, 1], [], []>} : vector<8x128xbf16>, vector<128x128xbf16>, vector<8x128xf32> -> vector<8x128xf32>
    %3 = tpu.iota {dimensions = array<i32: 1>} : vector<8x128xi32>
    %c0_3 = arith.constant 0 : index
    %c0_4 = arith.constant 0 : index
    %4 = vector.load %arg6[%c0_3, %c0_4] : memref<8x1xi32, #tpu.memory_space<vmem>>, vector<8x1xi32>
    %5 = vector.broadcast %4 : vector<8x1xi32> to vector<8x128xi32>
    %6 = arith.cmpi eq, %3, %5 : vector<8x128xi32>
    %cst_5 = arith.constant 0.000000e+00 : f32
    %7 = vector.broadcast %cst_5 : f32 to vector<8x128xf32>
    %8 = arith.select %6, %2, %7 : vector<8x128xi1>, vector<8x128xf32>
    %cst_6 = arith.constant dense<0.000000e+00> : vector<8xf32>
    %9 = vector.multi_reduction <add>, %8, %cst_6 [1] : vector<8x128xf32> to vector<8xf32>
    %10 = vector.shape_cast %9 : vector<8xf32> to vector<8x1xf32>
    %c0_7 = arith.constant 0 : index
    %c0_8 = arith.constant 0 : index
    %11 = vector.load %arg5[%c0_7, %c0_8] : memref<1x128xf32, #tpu.memory_space<vmem>>, vector<1x128xf32>
    %cst_9 = arith.constant 0.000000e+00 : f32
    %12 = vector.shape_cast %11 : vector<1x128xf32> to vector<1x128xf32>
    %13 = vector.broadcast %12 : vector<1x128xf32> to vector<8x128xf32>
    %14 = vector.broadcast %cst_9 : f32 to vector<8x128xf32>
    %15 = arith.select %6, %13, %14 : vector<8x128xi1>, vector<8x128xf32>
    %cst_10 = arith.constant dense<0.000000e+00> : vector<8xf32>
    %16 = vector.multi_reduction <add>, %15, %cst_10 [1] : vector<8x128xf32> to vector<8xf32>
    %17 = vector.shape_cast %16 : vector<8xf32> to vector<8x1xf32>
    %18 = math.sqrt %17 : vector<8x1xf32>
    %c0_11 = arith.constant 0 : index
    %c0_12 = arith.constant 0 : index
    %19 = vector.load %arg3[%c0_11, %c0_12] : memref<8x128xbf16, #tpu.memory_space<vmem>>, vector<8x128xbf16>
    %20 = arith.extf %19 : vector<8x128xbf16> to vector<8x128xf32>
    %21 = arith.mulf %20, %20 : vector<8x128xf32>
    %cst_13 = arith.constant dense<0.000000e+00> : vector<8xf32>
    %22 = vector.multi_reduction <add>, %21, %cst_13 [1] : vector<8x128xf32> to vector<8xf32>
    %23 = vector.shape_cast %22 : vector<8xf32> to vector<8x1xf32>
    %24 = math.sqrt %23 : vector<8x1xf32>
    %25 = arith.mulf %18, %24 : vector<8x1xf32>
    %cst_14 = arith.constant 1.000000e-10 : f32
    %26 = vector.broadcast %cst_14 : f32 to vector<8x1xf32>
    %27 = arith.addf %25, %26 : vector<8x1xf32>
    %28 = arith.divf %10, %27 : vector<8x1xf32>
    %29 = arith.mulf %28, %28 : vector<8x1xf32>
    %cst_15 = arith.constant 1.000000e+00 : f32
    %30 = vector.broadcast %cst_15 : f32 to vector<8x1xf32>
    %31 = arith.subf %30, %29 : vector<8x1xf32>
    %cst_16 = arith.constant 0.000000e+00 : f32
    %32 = vector.broadcast %cst_16 : f32 to vector<8x1xf32>
    %33 = arith.mulf %28, %28 : vector<8x1xf32>
    %34 = arith.mulf %33, %28 : vector<8x1xf32>
    %35 = arith.mulf %34, %28 : vector<8x1xf32>
    %cst_17 = arith.constant 1.000000e+00 : f32
    %36 = vector.broadcast %cst_17 : f32 to vector<8x1xf32>
    %37 = arith.mulf %36, %35 : vector<8x1xf32>
    %cst_18 = arith.constant 1.000000e+00 : f32
    %38 = vector.broadcast %cst_18 : f32 to vector<8x1xf32>
    %39 = arith.mulf %37, %38 : vector<8x1xf32>
    %40 = arith.addf %32, %39 : vector<8x1xf32>
    %41 = arith.mulf %28, %28 : vector<8x1xf32>
    %cst_19 = arith.constant -6.000000e+00 : f32
    %42 = vector.broadcast %cst_19 : f32 to vector<8x1xf32>
    %43 = arith.mulf %42, %41 : vector<8x1xf32>
    %44 = arith.mulf %43, %31 : vector<8x1xf32>
    %45 = arith.addf %40, %44 : vector<8x1xf32>
    %cst_20 = arith.constant 1.000000e+00 : f32
    %46 = vector.broadcast %cst_20 : f32 to vector<8x1xf32>
    %cst_21 = arith.constant 1.000000e+00 : f32
    %47 = vector.broadcast %cst_21 : f32 to vector<8x1xf32>
    %48 = arith.mulf %47, %46 : vector<8x1xf32>
    %49 = arith.mulf %31, %31 : vector<8x1xf32>
    %50 = arith.mulf %48, %49 : vector<8x1xf32>
    %51 = arith.addf %45, %50 : vector<8x1xf32>
    %cst_22 = arith.constant -0.99999988 : f32
    %cst_23 = arith.constant 0.99999988 : f32
    %52 = vector.broadcast %cst_22 : f32 to vector<8x1xf32>
    %53 = arith.maximumf %52, %28 : vector<8x1xf32>
    %54 = vector.broadcast %cst_23 : f32 to vector<8x1xf32>
    %55 = arith.minimumf %54, %53 : vector<8x1xf32>
    %cst_24 = arith.constant 0.000000e+00 : f32
    %56 = vector.broadcast %cst_24 : f32 to vector<8x1xf32>
    %cst_25 = arith.constant 0.707106769 : f32
    %57 = vector.broadcast %cst_25 : f32 to vector<8x1xf32>
    %58 = arith.cmpf ole, %55, %57 : vector<8x1xf32>
    %cst_26 = arith.constant 1.000000e+00 : f32
    %cst_27 = arith.constant 0.000000e+00 : f32
    %59 = vector.broadcast %cst_26 : f32 to vector<8x1xf32>
    %60 = vector.broadcast %cst_27 : f32 to vector<8x1xf32>
    %61 = arith.select %58, %59, %60 : vector<8x1xi1>, vector<8x1xf32>
    %62 = arith.addf %56, %61 : vector<8x1xf32>
    %cst_28 = arith.constant 6.12323426E-17 : f32
    %63 = vector.broadcast %cst_28 : f32 to vector<8x1xf32>
    %64 = arith.cmpf ole, %55, %63 : vector<8x1xf32>
    %cst_29 = arith.constant 1.000000e+00 : f32
    %cst_30 = arith.constant 0.000000e+00 : f32
    %65 = vector.broadcast %cst_29 : f32 to vector<8x1xf32>
    %66 = vector.broadcast %cst_30 : f32 to vector<8x1xf32>
    %67 = arith.select %64, %65, %66 : vector<8x1xi1>, vector<8x1xf32>
    %68 = arith.addf %62, %67 : vector<8x1xf32>
    %cst_31 = arith.constant -0.707106769 : f32
    %69 = vector.broadcast %cst_31 : f32 to vector<8x1xf32>
    %70 = arith.cmpf ole, %55, %69 : vector<8x1xf32>
    %cst_32 = arith.constant 1.000000e+00 : f32
    %cst_33 = arith.constant 0.000000e+00 : f32
    %71 = vector.broadcast %cst_32 : f32 to vector<8x1xf32>
    %72 = vector.broadcast %cst_33 : f32 to vector<8x1xf32>
    %73 = arith.select %70, %71, %72 : vector<8x1xi1>, vector<8x1xf32>
    %74 = arith.addf %68, %73 : vector<8x1xf32>
    %cst_34 = arith.constant 2.000000e+00 : f32
    %75 = vector.broadcast %cst_34 : f32 to vector<8x1xf32>
    %76 = arith.remf %74, %75 : vector<8x1xf32>
    %cst_35 = arith.constant 0.000000e+00 : f32
    %77 = vector.broadcast %cst_35 : f32 to vector<8x1xf32>
    %78 = arith.cmpf one, %76, %77 : vector<8x1xf32>
    %cst_36 = arith.constant 0.000000e+00 : f32
    %79 = vector.broadcast %cst_36 : f32 to vector<8x1xf32>
    %80 = arith.cmpf olt, %76, %79 : vector<8x1xf32>
    %cst_37 = arith.constant 0.000000e+00 : f32
    %81 = arith.cmpf olt, %cst_34, %cst_37 : f32
    %82 = vector.broadcast %81 : i1 to vector<8x1xi1>
    %83 = vector.broadcast %82 : vector<8x1xi1> to vector<8x1xi1>
    %84 = arith.xori %80, %83 : vector<8x1xi1>
    %85 = arith.andi %84, %78 : vector<8x1xi1>
    %86 = vector.broadcast %cst_34 : f32 to vector<8x1xf32>
    %87 = arith.addf %76, %86 : vector<8x1xf32>
    %88 = arith.select %85, %87, %76 : vector<8x1xi1>, vector<8x1xf32>
    %cst_38 = arith.constant 5.000000e-01 : f32
    %89 = vector.broadcast %cst_38 : f32 to vector<8x1xf32>
    %90 = arith.cmpf olt, %88, %89 : vector<8x1xf32>
    %cst_39 = arith.constant 1.000000e+00 : f32
    %cst_40 = arith.constant -1.000000e+00 : f32
    %91 = vector.broadcast %cst_39 : f32 to vector<8x1xf32>
    %92 = vector.broadcast %cst_40 : f32 to vector<8x1xf32>
    %93 = arith.select %90, %91, %92 : vector<8x1xi1>, vector<8x1xf32>
    %94 = arith.mulf %18, %24 : vector<8x1xf32>
    %95 = arith.mulf %93, %51 : vector<8x1xf32>
    %cst_41 = arith.constant 2.000000e+00 : f32
    %96 = vector.broadcast %cst_41 : f32 to vector<8x1xf32>
    %97 = arith.mulf %96, %74 : vector<8x1xf32>
    %98 = arith.subf %95, %97 : vector<8x1xf32>
    %99 = arith.mulf %94, %98 : vector<8x1xf32>
    %c0_42 = arith.constant 0 : index
    %100 = memref.load %arg2[%c0_42] : memref<1xf32, #tpu.memory_space<smem>>
    %101 = vector.broadcast %100 : f32 to vector<8x1xf32>
    %102 = arith.mulf %101, %10 : vector<8x1xf32>
    %103 = arith.addf %99, %102 : vector<8x1xf32>
    %cst_43 = arith.constant 1.000000e+00 : f32
    %104 = arith.addf %cst_43, %100 : f32
    %105 = vector.broadcast %104 : f32 to vector<8x1xf32>
    %106 = arith.divf %103, %105 : vector<8x1xf32>
    %107 = vector.shape_cast %106 : vector<8x1xf32> to vector<8x1xf32>
    %108 = vector.broadcast %107 : vector<8x1xf32> to vector<8x128xf32>
    %109 = arith.select %6, %108, %2 : vector<8x128xi1>, vector<8x128xf32>
    %c0_44 = arith.constant 0 : index
    %110 = memref.load %arg1[%c0_44] : memref<1xi32, #tpu.memory_space<smem>>
    %111 = vector.broadcast %110 : i32 to vector<8x128xi32>
    %112 = arith.cmpi slt, %3, %111 : vector<8x128xi32>
    %cst_45 = arith.constant -1.000000e+30 : f32
    %113 = vector.broadcast %cst_45 : f32 to vector<8x128xf32>
    %114 = arith.select %112, %109, %113 : vector<8x128xi1>, vector<8x128xf32>
    %cst_46 = arith.constant dense<0xFF800000> : vector<8xf32>
    %115 = vector.multi_reduction <maximumf>, %114, %cst_46 [1] : vector<8x128xf32> to vector<8xf32>
    %116 = vector.shape_cast %115 : vector<8xf32> to vector<8x1xf32>
    %117 = vector.broadcast %116 : vector<8x1xf32> to vector<8x128xf32>
    %118 = arith.subf %114, %117 : vector<8x128xf32>
    %119 = math.exp %118 : vector<8x128xf32>
    %cst_47 = arith.constant dense<0.000000e+00> : vector<8xf32>
    %120 = vector.multi_reduction <add>, %119, %cst_47 [1] : vector<8x128xf32> to vector<8xf32>
    %121 = vector.shape_cast %120 : vector<8xf32> to vector<8x1xf32>
    %122 = math.log %121 : vector<8x1xf32>
    %123 = arith.addf %116, %122 : vector<8x1xf32>
    %124 = arith.subf %123, %106 : vector<8x1xf32>
    %c0_48 = arith.constant 0 : index
    %c0_49 = arith.constant 0 : index
    %125 = vector.load %arg7[%c0_48, %c0_49] : memref<8x1xf32, #tpu.memory_space<vmem>>, vector<8x1xf32>
    tpu.vector_store %arg7[%c0_48, %c0_49], %124 {strides = array<i32>} : memref<8x1xf32, #tpu.memory_space<vmem>>, vector<8x1xf32>,
    return
  }
  func.func @transform_0(%arg0: i32) -> i32 {
    %c0_i32 = arith.constant 0 : i32
    %c0_i32_0 = arith.constant 0 : i32
    return %c0_i32 : i32
  }
  func.func @transform_1(%arg0: i32) -> i32 {
    %c0_i32 = arith.constant 0 : i32
    %c0_i32_0 = arith.constant 0 : i32
    return %c0_i32 : i32
  }
  func.func @transform_2(%arg0: i32) -> (i32, i32) {
    %c0_i32 = arith.constant 0 : i32
    %c0_i32_0 = arith.constant 0 : i32
    return %arg0, %c0_i32 : i32, i32
  }
  func.func @transform_3(%arg0: i32) -> (i32, i32) {
    %c0_i32 = arith.constant 0 : i32
    %c0_i32_0 = arith.constant 0 : i32
    %c0_i32_1 = arith.constant 0 : i32
    return %c0_i32, %c0_i32_0 : i32, i32
  }
  func.func @transform_4(%arg0: i32) -> (i32, i32) {
    %c0_i32 = arith.constant 0 : i32
    %c0_i32_0 = arith.constant 0 : i32
    %c0_i32_1 = arith.constant 0 : i32
    return %c0_i32, %c0_i32_0 : i32, i32
  }
  func.func @transform_5(%arg0: i32) -> (i32, i32) {
    %c0_i32 = arith.constant 0 : i32
    %c0_i32_0 = arith.constant 0 : i32
    return %arg0, %c0_i32 : i32, i32
  }
  func.func @transform_6(%arg0: i32) -> (i32, i32) {
    %c0_i32 = arith.constant 0 : i32
    %c0_i32_0 = arith.constant 0 : i32
    return %arg0, %c0_i32 : i32, i32
  }
}

</mosaic_0001>

<bundles_post_ra>
// kernel: tpu_custom_call.1
= control target key start
LH: loop header
LB: loop body
LE: loop exit
PB: predicated region body
PF: predicated region fallthrough
CT: control target
= control target key end

     0   :  { %s866_s0 = inlined_call_operand.<no memory space> [shape: s32[1], index: 0, kind: input, shape index: {}]   ;;  %s867_s1 = inlined_call_operand.<no memory space> [shape: f32[1], index: 1, kind: input, shape index: {}]   ;;  %s868_s2 = inlined_call_operand.vmem [shape: bf16[16,128], index: 2, kind: input, shape index: {}]   ;;  %s869_s3 = inlined_call_operand.hbm [shape: bf16[128,128], index: 3, kind: input, shape index: {}]   ;;  %s870_s4 = inlined_call_operand.vmem [shape: f32[1,128], index: 4, kind: input, shape index: {}]   ;;  %s871_s5 = inlined_call_operand.vmem [shape: s32[16,1], index: 5, kind: input, shape index: {}]   ;;  %s872_s6 = inlined_call_operand.vmem [shape: f32[16,1], index: 6, kind: output, shape index: {}]  }
   0x1   :  { %11 = sst [smem:[#allocation2]] %s866_s0 }
   0x2   :  { %12 = sst [smem:[#allocation3]] %s867_s1 }
   0x3   :  { %13 = vsyncpa [#allocation5], 0  ;;  %s760_s25 = smov 0  }
   0x4 LB: > { %s766_s26 = sadd.s32 4294967295, %s710_s25   ;;  %p577_p0 = scmp.ge.s32.totalorder %s710_s25, 1  ;;  %s710_s25 = sphi %s760_s25, %s19_s25  }
   0x5   : > { %p186_p1 = scmp.lt.s32.totalorder %s710_s25, 3  ;;  %s712_s0 = smov [#allocation4]  }
   0x6   : > { %s204_s27 = sshll.u32 %s712_s0, 4  ;;  %p873_p3 = scmp.eq.s32.totalorder %s766_s26, 0  ;;  %s205_s27 = int_to_ptr.vmem [resolvable:$true] %s204_s27 }
   0x7   : > { %p770_p2 = pnand %p577_p0, %p186_p1  ;;  %s672_s7 = scalar_lea.hbm %s869_s3, 1024 }
   0x8   : > { %p673_p6 = scmp.ne.s32.totalorder %s869_s3, %s672_s7  ;;  %p679_p10 = scmp.lt.u32.totalorder %s672_s7, %s869_s3 }
   0x9   : > { %s875_s1 = scalar_select %p770_p2, 1, 0 }
   0xa   : > { %p630_p4 = pneg %p770_p2 }
   0xc   : > { %p779_p5 = pnand %p873_p3, %p630_p4 }
   0xe   : > { %p674_p7 = pneg %p779_p5 }
  0x10   : > { %p675_p8 = pnand %p674_p7, %p673_p6 }
  0x12   : > { %p676_p9 = pneg %p675_p8 }
  0x14   : > { %p681_p11 = pnand %p679_p10, %p676_p9 }
  0x16   : > { %684 = shalt.err (!%p681_p11)
}
  0x17   : > { %s685_s12 = scalar_lea.vmem %s205_s27, 1024  ;;  %p693_p1 = scmp.lt.s32.totalorder %s205_s27, %s205_s27 }
  0x18   : > { %p686_p12 = scmp.ne.s32.totalorder %s205_s27, %s685_s12  ;;  %p694_p4 = scmp.lt.s32.totalorder %s685_s12, %s685_s12 }
  0x1a   : > { %p688_p13 = pnand %p686_p12, %p674_p7  ;;  %p695_p3 = por %p694_p4, %p693_p1 }
  0x1c   : > { %p689_p0 = pneg %p688_p13 }
  0x1e   : > { %p696_p2 = pnand %p695_p3, %p689_p0 }
  0x20   : > { %699 = shalt.err (!%p696_p2)
}
  0x21   : > { %s713_s13 = smov 64   ;;  %s714_s14 = smov 4  }
  0x22   : > { %633 = dma.hbm_to_vmem [thread:$0]  (!%p779_p5), %s869_s3, 1024, %s205_s27, [#allocation5], %s713_s13, %s713_s13, %s714_s14  }
  0x23   : > { %p877_p6 = scmp.ne.s32.totalorder %s875_s1, 0 }
  0x24   : > { %p878_p8 = scmp.eq.s32.totalorder (!%p877_p6), %s766_s26, 0 }
  0x25   : > { %237 = sbr.rel (%p877_p6) target bundleno = 793 (0x319), region = 44 }
  0x2c   : > { %705 = dma.done.wait (%p878_p8), [#allocation5], 1024   ;;  %p879_p7 = pmov %p878_p8 }
  0x2d   : > { %v715_v0 = vmov 0.0   ;;  %vm716_vm0 = vmmov 0   ;;  %v717_v1 = vmov 0   ;;  %p269_p2 = scmp.lt.s32.totalorder %s766_s26, 1  ;;  %v652_v2 = vld [vmem:[#allocation4] sm:$0xff]   ;;  %v653_v3 = vld [vmem:[#allocation4 + $0x8] sm:$0xff]   ;;  %v387_v14 = vlaneseq }
  0x2e   : > { %707 = vsyncadd (%p879_p7), [#allocation5], 4294966272  ;;  %606 = vmatprep.subr.bf16.mxu0 %v715_v0  ;;  %622 = vmatprep.mubr.msk.bf16.mxu0 %vm716_vm0, %v715_v0  ;;  %v654_v4 = vld [vmem:[#allocation4 + $0x10] sm:$0xff]   ;;  %v655_v6 = vld [vmem:[#allocation4 + $0x18] sm:$0xff]   ;;  %s849_s1 = sld [smem:[#allocation3]]  ;;  %vm496_vm15 = vcmask 7168  }
  0x2f   : > { %651 = vset.pattern.permute.xlu0 %v717_v1  ;;  %s881_s26 = smov (!%p269_p2, %s766_s26), 1  ;;  %607 = vmatpush3.bf16.msra.mxu0 %v652_v2  ;;  %v656_v10 = vld [vmem:[#allocation4 + $0x20] sm:$0xff]   ;;  %v657_v11 = vld [vmem:[#allocation4 + $0x28] sm:$0xff]   ;;  %v658_v12 = vld [vmem:[#allocation4 + $0x30] sm:$0xff]   ;;  %v828_v15 = vand.u32 127, %v387_v14  ;;  %s481_s29 = sld [smem:[#allocation2]] }
  0x30   : > { %s583_s17 = sshll.u32 %s881_s26, 3  ;;  %608 = vmatprep.subr.bf16.mxu0 %v715_v0  ;;  %s582_s18 = sshll.u32 %s881_s26, 2  ;;  %v659_v13 = vld [vmem:[#allocation4 + $0x38] sm:$0xff]   ;;  %v593_v16 = vld [vmem:[%s870_s4] ss:$0 sm:$0xff] }
  0x31   : > { %s276_s21 = scalar_lea.vmem %s871_s5, %s583_s17  ;;  %s272_s24 = scalar_lea.vmem %s868_s2, %s582_s18 }
  0x32   : > { %v389_v5 = vld [vmem:[%s276_s21] sm:$0xff]  ;;  %s280_s8 = scalar_lea.vmem %s872_s6, %s583_s17 }
  0x33   : > { %609 = vmatpush3.bf16.msra.mxu0 %v653_v3  ;;  %391 = vperm.xlu0 %651, %v389_v5   ;;  %v282_v7 = vld [vmem:[%s272_s24] sm:$0xf] }
  0x34   : > { %610 = vmatprep.subr.bf16.mxu0 %v715_v0  ;;  %v414_v8 = vunpack.c.l.bf16 %v282_v7  ;;  %s476_s28 = sadd.f32 1.0, %s849_s1 }
  0x36   : > { %v415_v9 = vmul.f32 %v414_v8, %v414_v8  ;;  %v477_v61 = vstv %s476_s28  ;;  %v473_v8 = vstv %s849_s1 }
  0x37   : > { %611 = vmatpush3.bf16.msra.mxu0 %v654_v4  ;;  %v718_v4 = vmov -1.0  }
  0x38   : > { %612 = vmatprep.subr.bf16.mxu0 %v715_v0  ;;  %416 = vadd.xlane.f32.xlu1 %v415_v9 }
  0x3b   : > { %613 = vmatpush3.bf16.msra.mxu0 %v655_v6 }
  0x3c   : > { %614 = vmatprep.subr.bf16.mxu0 %v715_v0 }
  0x3f   : > { %615 = vmatpush3.bf16.msra.mxu0 %v656_v10 }
  0x40   : > { %616 = vmatprep.subr.bf16.mxu0 %v715_v0 }
  0x43   : > { %617 = vmatpush3.bf16.msra.mxu0 %v657_v11 }
  0x44   : > { %618 = vmatprep.subr.bf16.mxu0 %v715_v0 }
  0x47   : > { %619 = vmatpush3.bf16.msra.mxu0 %v658_v12 }
  0x48   : > { %620 = vmatprep.subr.bf16.mxu0 %v715_v0 }
  0x4b   : > { %621 = vmatpush3.bf16.msra.mxu0 %v659_v13  ;;  %v482_v13 = vstv %s481_s29 }
  0x4c   : > { %vm483_vm14 = vcmp.lt.s32.totalorder %v828_v15, %v482_v13 }
  0x4e   : > { %623 = vmatmul.mubr.bf16.vlgmr.msra.gmra.mrb[0].mxu0 %v282_v7 }
  0xb2   : > { %v833_v17 = vpop.permute.xlu0 %391 }
  0xb3   : > { %vm393_vm1 = vcmp.eq.s32.totalorder %v828_v15, %v833_v17 }
  0xb4   : > { %v404_v18 = vsel %vm393_vm1, %v593_v16, 0.0 }
  0xb5   : > { %405 = vadd.xlane.f32.xlu0 %v404_v18 }
  0xc5   : > { %v417_v24 = vpop.xlane.xlu1 %416 }
  0xc6   : > { %660 = vrsqrt.f32 %v417_v24  ;;  %vm420_vm3 = vcmp.eq.f32.partialorder %v417_v24, inf  ;;  %v423_v31 = vand.u32 2147483648, %v417_v24  ;;  %vm422_vm5 = vcmp.eq.f32.partialorder %v417_v24, 0.0 }
  0xd0   : > { %v661_v26 = vpop.eup %660 }
  0xd1   : > { %v419_v29 = vmul.f32 %v661_v26, %v417_v24 }
  0xd3   : > { %v421_v33 = vsel %vm420_vm3, %v417_v24, %v419_v29 }
  0xd4   : > { %v424_v35 = vsel %vm422_vm5, %v423_v31, %v421_v33 }
 0x121   : > { %v840_v19 = vpop.f32.mrb[0].mxu0 }
 0x122   : > { %v624_v20 = vpop.f32.mrb[1].mxu0  ;;  %v394_v21 = vsel %vm393_vm1, %v840_v19, 0.0 }
 0x123   : > { %395 = vadd.xlane.f32.xlu1 %v394_v21  ;;  %v384_v22 = vpop.f32.mrb[2].mxu0 }
 0x124   : > { %v625_v23 = vpop.f32.mrb[3].mxu0 }
 0x142   : > { %v406_v25 = vpop.xlane.xlu0 %405 }
 0x143   : > { %662 = vrsqrt.f32 %v406_v25  ;;  %vm409_vm2 = vcmp.eq.f32.partialorder %v406_v25, inf  ;;  %v412_v30 = vand.u32 2147483648, %v406_v25  ;;  %vm411_vm4 = vcmp.eq.f32.partialorder %v406_v25, 0.0 }
 0x14d   : > { %v663_v27 = vpop.eup %662 }
 0x14e   : > { %v408_v28 = vmul.f32 %v663_v27, %v406_v25 }
 0x150   : > { %v410_v32 = vsel %vm409_vm2, %v406_v25, %v408_v28 }
 0x151   : > { %v413_v34 = vsel %vm411_vm4, %v412_v30, %v410_v32 }
 0x152   : > { %v425_v36 = vmul.f32 %v424_v35, %v413_v34 }
 0x154   : > { %v426_v37 = vadd.f32 1e-10, %v425_v36 }
 0x156   : > { %664 = vrcp.f32 %v426_v37 }
 0x157   : > { %666 = vrcp.f32 %v477_v61 }
 0x160   : > { %v665_v38 = vpop.eup %664 }
 0x161   : > { %v667_v12 = vpop.eup %666 }
 0x1b0   : > { %v396_v39 = vpop.xlane.xlu1 %395 }
 0x1b1   : > { %v428_v40 = vmul.f32 %v665_v38, %v396_v39  ;;  %v474_v11 = vmul.f32 %v473_v8, %v396_v39 }
 0x1b3   : > { %v594_v41 = vclamps-f32 %v428_v40, 0.9999999  ;;  %v429_v49 = vmul.f32 %v428_v40, %v428_v40 }
 0x1b5   : > { %vm441_vm6 = vcmp.le.f32.partialorder %v594_v41, 0.70710677  ;;  %vm444_vm7 = vcmp.le.f32.partialorder %v594_v41, 6.123234e-17  ;;  %vm447_vm8 = vcmp.le.f32.partialorder %v594_v41, -0.70710677  ;;  %v431_v53 = vmul.f32 %v429_v49, %v428_v40 }
 0x1b6   : > { %v442_v42 = vsel %vm441_vm6, 1.0, %v715_v0  ;;  %v445_v43 = vsel %vm444_vm7, 1.0, %v715_v0  ;;  %v448_v45 = vsel %vm447_vm8, 1.0, %v715_v0  ;;  %v430_v52 = vsub.f32 1.0, %v429_v49 }
 0x1b7   : > { %v446_v44 = vadd.f32 %v445_v43, %v442_v42  ;;  %v434_v54 = vmul.f32 -6.0, %v429_v49  ;;  %v432_v56 = vmul.f32 %v431_v53, %v428_v40 }
 0x1b8   : > { %v437_v1 = vmul.f32 %v430_v52, %v430_v52 }
 0x1b9   : > { %v449_v46 = vadd.f32 %v448_v45, %v446_v44  ;;  %v435_v57 = vmul.f32 %v434_v54, %v430_v52 }
 0x1bb   : > { %v450_v47 = vand.u32 2147483647, %v449_v46  ;;  %v459_v60 = vand.u32 2147483648, %v449_v46  ;;  %v436_v63 = vadd.f32 %v435_v57, %v432_v56  ;;  %v469_v7 = vmul.f32 2.0, %v449_v46 }
 0x1bd   : > { %v452_v48 = vmul.f32 0.5, %v450_v47  ;;  %v438_v3 = vadd.f32 %v437_v1, %v436_v63 }
 0x1bf   : > { %v453_v50 = vfloor.f32 %v452_v48 }
 0x1c1   : > { %v454_v51 = vmul.f32 2.0, %v453_v50 }
 0x1c3   : > { %v455_v55 = vsub.f32 %v450_v47, %v454_v51 }
 0x1c5   : > { %vm456_vm9 = vcmp.eq.f32.partialorder %v455_v55, 2.0 }
 0x1c6   : > { %v457_v58 = vsel %vm456_vm9, 0.0, %v455_v55 }
 0x1c7   : > { %v458_v59 = vand.u32 2147483647, %v457_v58 }
 0x1c9   : > { %v460_v62 = vor.u32 %v459_v60, %v458_v59 }
 0x1cb   : > { %vm461_vm10 = vcmp.ne.f32.partialorder %v460_v62, 0.0  ;;  %vm462_vm11 = vcmp.lt.f32.partialorder %v460_v62, 0.0  ;;  %v464_v0 = vadd.f32 2.0, %v460_v62 }
 0x1cc   : > { %vm463_vm12 = vmand %vm462_vm11, %vm461_vm10 }
 0x1cd   : > { %v465_v2 = vsel %vm463_vm12, %v464_v0, %v460_v62 }
 0x1ce   : > { %vm466_vm13 = vcmp.lt.f32.partialorder %v465_v2, 0.5 }
 0x1cf   : > { %v467_v5 = vsel %vm466_vm13, 1.0, %v718_v4 }
 0x1d0   : > { %v468_v6 = vmul.f32 %v467_v5, %v438_v3 }
 0x1d2   : > { %v470_v9 = vsub.f32 %v468_v6, %v469_v7 }
 0x1d4   : > { %v471_v10 = vmul.f32 %v470_v9, %v425_v36 }
 0x1d6   : > { %v475_v14 = vadd.f32 %v474_v11, %v471_v10 }
 0x1d8   : > { %v479_v16 = vmul.f32 %v667_v12, %v475_v14 }
 0x1da   : > { %v480_v18 = vsel %vm393_vm1, %v479_v16, %v840_v19 }
 0x1db   : > { %v484_v20 = vsel %vm483_vm14, %v480_v18, -1e+30 }
 0x1dc   : > { %485 = vmax.xlane.f32.xlu1 %v484_v20 }
 0x269   : > { %v486_v21 = vpop.xlane.xlu1 %485 }
 0x26a   : > { %v487_v22 = vsub.f32 %v484_v20, %v486_v21 }
 0x26c   : > { %v488_v23 = vmul.f32 1.442695, %v487_v22 }
 0x26e   : > { %668 = vpow2.f32 %v488_v23 }
 0x278   : > { %v669_v24 = vpop.eup %668 }
 0x279   : > { %490 = vadd.xlane.f32.xlu1 %v669_v24 }
 0x306   : > { %v491_v25 = vpop.xlane.xlu1 %490 }
 0x307   : > { %670 = vlog2.f32 %v491_v25 }
 0x311   : > { %v671_v26 = vpop.eup %670 }
 0x312   : > { %v493_v27 = vmul.f32 0.6931472, %v671_v26 }
 0x314   : > { %v494_v28 = vadd.f32 %v493_v27, %v486_v21 }
 0x316   : > { %v495_v15 = vsub.f32 %v494_v28, %v479_v16 }
 0x318   : > { %497 = vst.msk [vmem:[%s280_s8] sm:$0xff] %vm496_vm15, %v495_v15 }
 0x319 PF: > { %s19_s25 = sadd.s32 1, %s710_s25  }
 0x31a   : > { %p16_p3 = scmp.ge.s32.totalorder %s19_s25, 4  }
 0x31c   :  { %18 = sbr.rel (!%p16_p3) target bundleno = 4 (0x4), region = 82 }
 0x323   :  { %517 = vsyncpa [#allocation5], 1 }
 0x324   :  { %519 = vsyncpa [#allocation5 + $0x1], 1 }

</bundles_post_ra>
